<compile_context>
chip_gen: v7x
topology: tpu7x:2x2x1
jax: 0.10.0
libtpu: 0.0.40
codegen_flags: <defaults>
</compile_context>

<pallas_src>
import jax
import jax.numpy as jnp
from jax.experimental import pallas as pl
from jax.experimental.pallas import tpu as pltpu


# ---------------------------------------------------------------------------
# Pass 1: attention map.  One grid step per batch sample.
# ---------------------------------------------------------------------------
def _psi_kernel(gT_ref, xsT_ref, wgT_ref, wxT_ref, b_ref, wpsi_ref, bpsi_ref,
                ah_ref, awT_ref, psi_up_ref):
    Hg = ah_ref.shape[1]
    Wg = awT_ref.shape[0]
    # Two fused 1x1 convs: relu(g^T W_g^T + x_s^T W_x^T + (b_g + b_x)).
    s = jnp.dot(gT_ref[...], wgT_ref[...], preferred_element_type=jnp.float32)
    s = s + jnp.dot(xsT_ref[...], wxT_ref[...], preferred_element_type=jnp.float32)
    s = jnp.maximum(s + b_ref[...], 0.0)                          # (Hg*Wg, K)
    # psi 1x1 conv + sigmoid.  K stays on the lane axis so this reshape only
    # splits the leading (sublane) dim -- layout preserving on TPU.
    s3 = s.reshape(Hg, Wg, s.shape[-1])                           # (Hg, Wg, K)
    psi = (s3 * wpsi_ref[...]).sum(axis=-1) + bpsi_ref[0]         # (Hg, Wg)
    psi = jax.nn.sigmoid(psi)
    # Separable bilinear upsample (align_corners=True): Ah @ psi @ Aw^T.
    up = jnp.dot(ah_ref[...], psi, preferred_element_type=jnp.float32)   # (H, Wg)
    psi_up_ref[...] = jnp.dot(
        up, awT_ref[...], preferred_element_type=jnp.float32
    ).astype(psi_up_ref.dtype)                                    # (H, W)


# ---------------------------------------------------------------------------
# Pass 2: lane-dense gating  out = x * psi_up  on (tile_c, H*W) blocks.
# ---------------------------------------------------------------------------
def _gate_kernel(x_ref, psi_ref, o_ref):
    o_ref[...] = (x_ref[...] * psi_ref[...]).astype(o_ref.dtype)


# ---------------------------------------------------------------------------
# Host-side helpers.
# ---------------------------------------------------------------------------
def _interp_matrix(out_size, in_size):
    """Row-interpolation matrix for bilinear upsampling, align_corners=True."""
    i = jnp.arange(out_size, dtype=jnp.float32)
    src = i * ((in_size - 1) / (out_size - 1))
    i0 = jnp.clip(jnp.floor(src).astype(jnp.int32), 0, in_size - 1)
    i1 = jnp.minimum(i0 + 1, in_size - 1)
    w1 = src - i0.astype(jnp.float32)
    w0 = 1.0 - w1
    rows = jnp.arange(out_size)
    A = jnp.zeros((out_size, in_size), jnp.float32)
    A = A.at[rows, i0].add(w0)
    A = A.at[rows, i1].add(w1)
    return A


def _pick_tile_c(cx, hw, itemsize, target_bytes=2 << 20):
    """Largest layout-friendly (multiple-of-8 or full) channel tile with a
    ~target_bytes per-buffer footprint (amortizes per-grid-step overhead)."""
    divisors = [d for d in range(1, cx + 1) if cx % d == 0]
    aligned = [d for d in divisors if d % 8 == 0 or d == cx]
    cap = max(1, target_bytes // max(1, hw * itemsize))
    within = [d for d in aligned if d <= cap]
    return max(within) if within else min(aligned)


def _vmem_limit(footprint_bytes):
    """Footprint-derived scoped-VMEM request with headroom, capped for v7x."""
    want = int(1.5 * footprint_bytes) + (4 << 20)
    return int(max(min(want, 40 << 20), footprint_bytes + (2 << 20), 16 << 20))


def spatial_attention(g, x, params, *, tile_c=None):
    """g: (N, Cg, Hg, Wg) NCHW, x: (N, Cx, 2Hg, 2Wg) NCHW -> (N, Cx, 2Hg, 2Wg)."""
    wg, bg, wx, bx, wpsi, bpsi = params
    N, Cg, Hg, Wgs = g.shape
    Nx, Cx, H, W = x.shape
    K = wg.shape[0]
    assert N == Nx and H == 2 * Hg and W == 2 * Wgs
    HgWg = Hg * Wgs
    HW = H * W
    itemsize = x.dtype.itemsize

    if tile_c is None:
        tile_c = _pick_tile_c(Cx, HW, itemsize)
    assert Cx % tile_c == 0 and (tile_c % 8 == 0 or tile_c == Cx), tile_c
    n_ct = Cx // tile_c

    # ---- host-side glue (small psi-path inputs only; x itself is untouched) ----
    # TODO(synk): the stride-2 subsample of x and the (HgWg, C) relayout of the
    # psi-path inputs stay in XLA; the in-kernel alternatives (strided gather,
    # minor-dim transpose, lane-splitting reshape) do not lower reliably in
    # Mosaic.  The data involved is only |x|/4 + |g|, small next to pass 2.
    xsT = x[:, :, ::2, ::2].reshape(N, Cx, HgWg).transpose(0, 2, 1)   # (N, HgWg, Cx)
    gT = g.reshape(N, Cg, HgWg).transpose(0, 2, 1)                    # (N, HgWg, Cg)
    wgT = wg.T.astype(jnp.float32)                                    # (Cg, K)
    wxT = wx.T.astype(jnp.float32)                                    # (Cx, K)
    b_row = (bg + bx).reshape(1, K).astype(jnp.float32)
    wpsi_row = wpsi.reshape(1, K).astype(jnp.float32)
    bpsi_s = bpsi.reshape(1).astype(jnp.float32)
    ah = _interp_matrix(H, Hg)                                        # (H, Hg)
    awT = _interp_matrix(W, Wgs).T                                    # (Wg, W)

    # ------------------------- pass 1: psi_up (N, H, W) -------------------------
    fp1 = (2 * HgWg * (Cg + Cx) * g.dtype.itemsize      # gT/xsT double-buffered
           + 2 * HW * itemsize                          # psi_up double-buffered
           + 4 * ((Cg + Cx) * K + 2 * K + H * Hg + Wgs * W))
    cost1 = pl.CostEstimate(
        flops=int(N * (2 * HgWg * (Cg + Cx) * K + 2 * HgWg * K
                       + 2 * H * Hg * Wgs + 2 * H * Wgs * W)),
        transcendentals=int(N * HgWg),
        bytes_accessed=int(N * (HgWg * (Cg + Cx) * g.dtype.itemsize
                                + HW * itemsize)))
    psi_up = pl.pallas_call(
        _psi_kernel,
        out_shape=jax.ShapeDtypeStruct((N, H, W), x.dtype),
        grid=(N,),
        in_specs=[
            pl.BlockSpec((None, HgWg, Cg), lambda n: (n, 0, 0)),       # g^T
            pl.BlockSpec((None, HgWg, Cx), lambda n: (n, 0, 0)),       # x_sub^T
            pl.BlockSpec((Cg, K), lambda n: (0, 0)),                   # W_g^T
            pl.BlockSpec((Cx, K), lambda n: (0, 0)),                   # W_x^T
            pl.BlockSpec((1, K), lambda n: (0, 0)),                    # b_g + b_x
            pl.BlockSpec((1, K), lambda n: (0, 0)),                    # W_psi
            pl.BlockSpec(memory_space=pltpu.MemorySpace.SMEM),         # b_psi
            pl.BlockSpec((H, Hg), lambda n: (0, 0)),                   # Ah
            pl.BlockSpec((Wgs, W), lambda n: (0, 0)),                  # Aw^T
        ],
        out_specs=pl.BlockSpec((None, H, W), lambda n: (n, 0, 0)),
        compiler_params=pltpu.CompilerParams(
            dimension_semantics=("parallel",),
            vmem_limit_bytes=_vmem_limit(fp1)),
        cost_estimate=cost1,
    )(gT, xsT, wgT, wxT, b_row, wpsi_row, bpsi_s, ah, awT)

    # --------------------- pass 2: lane-dense gating out = x * psi ---------------------
    x_flat = x.reshape(N, Cx, HW)        # free contiguous reshape
    psi_flat = psi_up.reshape(N, 1, HW)  # free contiguous reshape
    fp2 = 4 * tile_c * HW * itemsize + 2 * HW * itemsize
    cost2 = pl.CostEstimate(
        flops=int(N * Cx * HW),
        transcendentals=0,
        bytes_accessed=int((2 * N * Cx * HW + N * HW) * itemsize))
    out_flat = pl.pallas_call(
        _gate_kernel,
        out_shape=jax.ShapeDtypeStruct((N, Cx, HW), x.dtype),
        grid=(N, n_ct),
        in_specs=[
            pl.BlockSpec((None, tile_c, HW), lambda n, c: (n, c, 0)),  # x tile
            pl.BlockSpec((None, 1, HW), lambda n, c: (n, 0, 0)),       # psi_up
        ],
        out_specs=pl.BlockSpec((None, tile_c, HW), lambda n, c: (n, c, 0)),
        compiler_params=pltpu.CompilerParams(
            dimension_semantics=("parallel", "parallel"),
            vmem_limit_bytes=_vmem_limit(fp2)),
        cost_estimate=cost2,
    )(x_flat, psi_flat)
    return out_flat.reshape(N, Cx, H, W)


# ---------------- pure-JAX reference (for correctness check) ----------------

def _upsample_bilinear_ref(p, Hout, Wout):
    N, C, Hin, Win = p.shape
    ys = jnp.arange(Hout, dtype=jnp.float32) * ((Hin - 1) / (Hout - 1))
    xs = jnp.arange(Wout, dtype=jnp.float32) * ((Win - 1) / (Wout - 1))
    y0 = jnp.clip(jnp.floor(ys).astype(jnp.int32), 0, Hin - 1)
    x0 = jnp.clip(jnp.floor(xs).astype(jnp.int32), 0, Win - 1)
    y1 = jnp.minimum(y0 + 1, Hin - 1)
    x1 = jnp.minimum(x0 + 1, Win - 1)
    wy1 = (ys - y0)[:, None]; wy0 = 1.0 - wy1
    wx1 = (xs - x0)[None, :]; wx0 = 1.0 - wx1
    gat = lambda yi, xi: p[:, :, yi[:, None], xi[None, :]]
    return (wy0 * wx0 * gat(y0, x0) + wy0 * wx1 * gat(y0, x1)
            + wy1 * wx0 * gat(y1, x0) + wy1 * wx1 * gat(y1, x1))


def spatial_attention_ref(g, x, params):
    wg, bg, wx, bx, wpsi, bpsi = params
    g1 = jnp.einsum('nchw,kc->nkhw', g, wg) + bg[None, :, None, None]
    xs = x[:, :, ::2, ::2]
    x1 = jnp.einsum('nchw,kc->nkhw', xs, wx) + bx[None, :, None, None]
    c = jax.nn.relu(g1 + x1)
    psi = jax.nn.sigmoid(jnp.einsum('nkhw,ok->nohw', c, wpsi.reshape(1, -1))
                         + bpsi.reshape(1, 1, 1, 1))
    psi_up = _upsample_bilinear_ref(psi, x.shape[2], x.shape[3])
    return x * psi_up


if __name__ == "__main__":
    key = jax.random.PRNGKey(0)
    kg, kx, k1, k2, k3, k4, k5, k6 = jax.random.split(key, 8)

    N, Cg, Cx, K = 2, 8, 16, 8          # in_channels_g=8, in_channels_x=16, intermediate=8
    Hg = Wgs = 8
    H = W = 16                          # x is at 2x the spatial resolution of g

    g = jax.random.normal(kg, (N, Cg, Hg, Wgs), jnp.float32)
    x = jax.random.normal(kx, (N, Cx, H, W), jnp.float32)

    # Deterministic synthetic parameters (1x1 conv weights stored as matrices).
    params = (
        0.3 * jax.random.normal(k1, (K, Cg), jnp.float32),   # W_g.weight (K,Cg,1,1)->(K,Cg)
        0.1 * jax.random.normal(k2, (K,), jnp.float32),      # W_g.bias
        0.3 * jax.random.normal(k3, (K, Cx), jnp.float32),   # W_x.weight (K,Cx,1,1)->(K,Cx)
        0.1 * jax.random.normal(k4, (K,), jnp.float32),      # W_x.bias
        0.3 * jax.random.normal(k5, (1, K), jnp.float32),    # psi.weight (1,K,1,1)->(1,K)
        0.1 * jax.random.normal(k6, (1,), jnp.float32),      # psi.bias
    )

    # tile_c=8 (aligned, divides Cx=16) exercises the channel-tile grid axis.
    out = jax.block_until_ready(spatial_attention(g, x, params, tile_c=8))
    ref = spatial_attention_ref(g, x, params)

    assert out.shape == x.shape
    err = float(jnp.max(jnp.abs(out - ref)))
    assert jnp.allclose(out, ref, atol=1e-4, rtol=1e-4), err
    print("KERNEL_OK")
</pallas_src>

<mosaic_0001>
module attributes {stable_mosaic.version = 11 : i64} {
  func.func @_psi_kernel(%arg0: i32, %arg1: memref<1x64x8xf32, #tpu.memory_space<vmem>>, %arg2: memref<1x64x16xf32, #tpu.memory_space<vmem>>, %arg3: memref<8x8xf32, #tpu.memory_space<vmem>>, %arg4: memref<16x8xf32, #tpu.memory_space<vmem>>, %arg5: memref<1x8xf32, #tpu.memory_space<vmem>>, %arg6: memref<1x8xf32, #tpu.memory_space<vmem>>, %arg7: memref<1xf32, #tpu.memory_space<smem>>, %arg8: memref<16x8xf32, #tpu.memory_space<vmem>>, %arg9: memref<8x16xf32, #tpu.memory_space<vmem>>, %arg10: memref<1x16x16xf32, #tpu.memory_space<vmem>>) attributes {dimension_semantics = [#tpu.dimension_semantics<parallel>], iteration_bounds = array<i64: 2>, scalar_prefetch = 0 : i64, scratch_operands = 0 : i64, tpu.core_type = #tpu.core_type<tc>, window_params = [{transform_indices = @transform_0, window_bounds = array<i64: 1, 64, 8>}, {transform_indices = @transform_1, window_bounds = array<i64: 1, 64, 16>}, {pipeline_mode = #tpu.pipeline_mode<synchronous>, transform_indices = @transform_2, window_bounds = array<i64: 8, 8>}, {pipeline_mode = #tpu.pipeline_mode<synchronous>, transform_indices = @transform_3, window_bounds = array<i64: 16, 8>}, {pipeline_mode = #tpu.pipeline_mode<synchronous>, transform_indices = @transform_4, window_bounds = array<i64: 1, 8>}, {pipeline_mode = #tpu.pipeline_mode<synchronous>, transform_indices = @transform_5, window_bounds = array<i64: 1, 8>}, {transform_indices = @transform_6, window_bounds = array<i64: 1>}, {pipeline_mode = #tpu.pipeline_mode<synchronous>, transform_indices = @transform_7, window_bounds = array<i64: 16, 8>}, {pipeline_mode = #tpu.pipeline_mode<synchronous>, transform_indices = @transform_8, window_bounds = array<i64: 8, 16>}, {transform_indices = @transform_9, window_bounds = array<i64: 1, 16, 16>}]} {
    %c0 = arith.constant 0 : index
    %c0_0 = arith.constant 0 : index
    %c0_1 = arith.constant 0 : index
    %0 = vector.load %arg1[%c0, %c0_0, %c0_1] : memref<1x64x8xf32, #tpu.memory_space<vmem>>, vector<1x64x8xf32>
    %1 = vector.shape_cast %0 : vector<1x64x8xf32> to vector<64x8xf32>
    %c0_2 = arith.constant 0 : index
    %c0_3 = arith.constant 0 : index
    %2 = vector.load %arg3[%c0_2, %c0_3] : memref<8x8xf32, #tpu.memory_space<vmem>>, vector<8x8xf32>
    %cst = arith.constant dense<0.000000e+00> : vector<64x8xf32>
    %3 = tpu.matmul %1, %2, %cst {dimension_numbers = #tpu.dot_dimension_numbers<[1], [0], [0], [1], [0, 0, 1, 1], [], []>} : vector<64x8xf32>, vector<8x8xf32>, vector<64x8xf32> -> vector<64x8xf32>
    %c0_4 = arith.constant 0 : index
    %c0_5 = arith.constant 0 : index
    %c0_6 = arith.constant 0 : index
    %4 = vector.load %arg2[%c0_4, %c0_5, %c0_6] : memref<1x64x16xf32, #tpu.memory_space<vmem>>, vector<1x64x16xf32>
    %5 = vector.shape_cast %4 : vector<1x64x16xf32> to vector<64x16xf32>
    %c0_7 = arith.constant 0 : index
    %c0_8 = arith.constant 0 : index
    %6 = vector.load %arg4[%c0_7, %c0_8] : memref<16x8xf32, #tpu.memory_space<vmem>>, vector<16x8xf32>
    %cst_9 = arith.constant dense<0.000000e+00> : vector<64x8xf32>
    %7 = tpu.matmul %5, %6, %cst_9 {dimension_numbers = #tpu.dot_dimension_numbers<[1], [0], [0], [1], [0, 0, 1, 1], [], []>} : vector<64x16xf32>, vector<16x8xf32>, vector<64x8xf32> -> vector<64x8xf32>
    %8 = arith.addf %3, %7 : vector<64x8xf32>
    %c0_10 = arith.constant 0 : index
    %c0_11 = arith.constant 0 : index
    %9 = vector.load %arg5[%c0_10, %c0_11] : memref<1x8xf32, #tpu.memory_space<vmem>>, vector<1x8xf32>
    %10 = vector.broadcast %9 : vector<1x8xf32> to vector<64x8xf32>
    %11 = arith.addf %8, %10 : vector<64x8xf32>
    %cst_12 = arith.constant 0.000000e+00 : f32
    %12 = vector.broadcast %cst_12 : f32 to vector<64x8xf32>
    %13 = arith.maximumf %11, %12 : vector<64x8xf32>
    %14 = vector.shape_cast %13 : vector<64x8xf32> to vector<8x8x8xf32>
    %c0_13 = arith.constant 0 : index
    %c0_14 = arith.constant 0 : index
    %15 = vector.load %arg6[%c0_13, %c0_14] : memref<1x8xf32, #tpu.memory_space<vmem>>, vector<1x8xf32>
    %16 = vector.shape_cast %15 : vector<1x8xf32> to vector<1x1x8xf32>
    %17 = vector.broadcast %16 : vector<1x1x8xf32> to vector<8x8x8xf32>
    %18 = arith.mulf %14, %17 : vector<8x8x8xf32>
    %cst_15 = arith.constant dense<0.000000e+00> : vector<8x8xf32>
    %19 = vector.multi_reduction <add>, %18, %cst_15 [2] : vector<8x8x8xf32> to vector<8x8xf32>
    %c0_16 = arith.constant 0 : index
    %20 = memref.load %arg7[%c0_16] : memref<1xf32, #tpu.memory_space<smem>>
    %21 = vector.broadcast %20 : f32 to vector<8x8xf32>
    %22 = arith.addf %19, %21 : vector<8x8xf32>
    %23 = arith.negf %22 : vector<8x8xf32>
    %24 = math.exp %23 : vector<8x8xf32>
    %cst_17 = arith.constant 1.000000e+00 : f32
    %25 = vector.broadcast %cst_17 : f32 to vector<8x8xf32>
    %26 = arith.addf %25, %24 : vector<8x8xf32>
    %27 = arith.divf %25, %26 : vector<8x8xf32>
    %c0_18 = arith.constant 0 : index
    %c0_19 = arith.constant 0 : index
    %28 = vector.load %arg8[%c0_18, %c0_19] : memref<16x8xf32, #tpu.memory_space<vmem>>, vector<16x8xf32>
    %cst_20 = arith.constant dense<0.000000e+00> : vector<16x8xf32>
    %29 = tpu.matmul %28, %27, %cst_20 {dimension_numbers = #tpu.dot_dimension_numbers<[1], [0], [0], [1], [0, 0, 1, 1], [], []>} : vector<16x8xf32>, vector<8x8xf32>, vector<16x8xf32> -> vector<16x8xf32>
    %c0_21 = arith.constant 0 : index
    %c0_22 = arith.constant 0 : index
    %30 = vector.load %arg9[%c0_21, %c0_22] : memref<8x16xf32, #tpu.memory_space<vmem>>, vector<8x16xf32>
    %cst_23 = arith.constant dense<0.000000e+00> : vector<16x16xf32>
    %31 = tpu.matmul %29, %30, %cst_23 {dimension_numbers = #tpu.dot_dimension_numbers<[1], [0], [0], [1], [0, 0, 1, 1], [], []>} : vector<16x8xf32>, vector<8x16xf32>, vector<16x16xf32> -> vector<16x16xf32>
    %c0_24 = arith.constant 0 : index
    %c0_25 = arith.constant 0 : index
    %c0_26 = arith.constant 0 : index
    %32 = vector.load %arg10[%c0_24, %c0_25, %c0_26] : memref<1x16x16xf32, #tpu.memory_space<vmem>>, vector<1x16x16xf32>
    %33 = vector.shape_cast %32 : vector<1x16x16xf32> to vector<16x16xf32>
    %34 = vector.shape_cast %31 : vector<16x16xf32> to vector<1x16x16xf32>
    tpu.vector_store %arg10[%c0_24, %c0_25, %c0_26], %34 {strides = array<i32>} : memref<1x16x16xf32, #tpu.memory_space<vmem>>, vector<1x16x16xf32>,
    return
  }
  func.func @transform_0(%arg0: i32) -> (i32, i32, i32) {
    %c0_i32 = arith.constant 0 : i32
    %c0_i32_0 = arith.constant 0 : i32
    %c0_i32_1 = arith.constant 0 : i32
    return %arg0, %c0_i32, %c0_i32_0 : i32, i32, i32
  }
  func.func @transform_1(%arg0: i32) -> (i32, i32, i32) {
    %c0_i32 = arith.constant 0 : i32
    %c0_i32_0 = arith.constant 0 : i32
    %c0_i32_1 = arith.constant 0 : i32
    return %arg0, %c0_i32, %c0_i32_0 : i32, i32, i32
  }
  func.func @transform_2(%arg0: i32) -> (i32, i32) {
    %c0_i32 = arith.constant 0 : i32
    %c0_i32_0 = arith.constant 0 : i32
    %c0_i32_1 = arith.constant 0 : i32
    return %c0_i32, %c0_i32_0 : i32, i32
  }
  func.func @transform_3(%arg0: i32) -> (i32, i32) {
    %c0_i32 = arith.constant 0 : i32
    %c0_i32_0 = arith.constant 0 : i32
    %c0_i32_1 = arith.constant 0 : i32
    return %c0_i32, %c0_i32_0 : i32, i32
  }
  func.func @transform_4(%arg0: i32) -> (i32, i32) {
    %c0_i32 = arith.constant 0 : i32
    %c0_i32_0 = arith.constant 0 : i32
    %c0_i32_1 = arith.constant 0 : i32
    return %c0_i32, %c0_i32_0 : i32, i32
  }
  func.func @transform_5(%arg0: i32) -> (i32, i32) {
    %c0_i32 = arith.constant 0 : i32
    %c0_i32_0 = arith.constant 0 : i32
    %c0_i32_1 = arith.constant 0 : i32
    return %c0_i32, %c0_i32_0 : i32, i32
  }
  func.func @transform_6(%arg0: i32) -> i32 {
    %c0_i32 = arith.constant 0 : i32
    %c0_i32_0 = arith.constant 0 : i32
    return %c0_i32 : i32
  }
  func.func @transform_7(%arg0: i32) -> (i32, i32) {
    %c0_i32 = arith.constant 0 : i32
    %c0_i32_0 = arith.constant 0 : i32
    %c0_i32_1 = arith.constant 0 : i32
    return %c0_i32, %c0_i32_0 : i32, i32
  }
  func.func @transform_8(%arg0: i32) -> (i32, i32) {
    %c0_i32 = arith.constant 0 : i32
    %c0_i32_0 = arith.constant 0 : i32
    %c0_i32_1 = arith.constant 0 : i32
    return %c0_i32, %c0_i32_0 : i32, i32
  }
  func.func @transform_9(%arg0: i32) -> (i32, i32, i32) {
    %c0_i32 = arith.constant 0 : i32
    %c0_i32_0 = arith.constant 0 : i32
    %c0_i32_1 = arith.constant 0 : i32
    return %arg0, %c0_i32, %c0_i32_0 : i32, i32, i32
  }
}

</mosaic_0001>

<bundles_post_ra>
// kernel: tpu_custom_call.1
= control target key start
LH: loop header
LB: loop body
LE: loop exit
PB: predicated region body
PF: predicated region fallthrough
CT: control target
= control target key end

     0   :  { %s1552_s0 = inlined_call_operand.vmem [shape: f32[2,64,8], index: 0, kind: input, shape index: {}]   ;;  %s1553_s1 = inlined_call_operand.vmem [shape: f32[2,64,16], index: 1, kind: input, shape index: {}]   ;;  %s1554_s2 = inlined_call_operand.vmem [shape: f32[8,8], index: 2, kind: input, shape index: {}]   ;;  %s1555_s3 = inlined_call_operand.vmem [shape: f32[16,8], index: 3, kind: input, shape index: {}]   ;;  %s1556_s4 = inlined_call_operand.vmem [shape: f32[1,8], index: 4, kind: input, shape index: {}]   ;;  %s1557_s5 = inlined_call_operand.vmem [shape: f32[1,8], index: 5, kind: input, shape index: {}]   ;;  %s1558_s6 = inlined_call_operand.<no memory space> [shape: f32[1], index: 6, kind: input, shape index: {}]   ;;  %s1559_s7 = inlined_call_operand.vmem [shape: f32[16,8], index: 7, kind: input, shape index: {}]   ;;  %s1560_s8 = inlined_call_operand.vmem [shape: f32[8,16], index: 8, kind: input, shape index: {}]   ;;  %s1561_s9 = inlined_call_operand.hbm [shape: f32[2,16,16], index: 9, kind: output, shape index: {}]  }
   0x1   :  { %14 = sst [smem:[#allocation2]] %s1558_s6 }
   0x2   :  { %15 = vsyncpa [#allocation4], 0 }
   0x3   :  { %17 = vsyncpa [#allocation4 + $0x1], 0  ;;  %s1382_s11 = smov 0   ;;  %s1384_s12 = smov 0  }
   0x4   :  { %s1386_s13 = smov 0   ;;  %s1388_s14 = smov 0  }
   0x5 LB: > { %s1403_s6 = sadd.s32 4294967295, %s1324_s14   ;;  %s1063_s15 = sadd.s32 4294967294, %s1324_s14   ;;  %s1324_s14 = sphi %s1388_s14, %s1567_s14   ;;  %s1320_s13 = sphi %s1386_s13, %s1566_s13   ;;  %s1316_s12 = sphi %s1384_s12, %s1565_s12   ;;  %s1312_s11 = sphi %s1382_s11, %s1564_s11  }
   0x6   : > { %s1407_s16 = sadd.s32 1, %s1324_s14   ;;  %s229_s17 = sadd.s32 1, %s1320_s13 }
   0x7   : > { %s226_s18 = ssub.s32 %s1324_s14, %s1407_s16  ;;  %p239_p0 = scmp.ne.s32.totalorder %s1320_s13, %s1316_s12 }
   0x8   : > { %p227_p1 = scmp.eq.s32.totalorder %s226_s18, 0  ;;  %p240_p2 = scmp.eq.s32.totalorder %s1403_s6, 1 }
   0x9   : > { %p245_p3 = scmp.ne.s32.totalorder %s1316_s12, %s1312_s11  ;;  %p246_p4 = scmp.eq.s32.totalorder %s1063_s15, 1 }
   0xa   : > { %s1418_s19 = scalar_select %p227_p1, %s1320_s13, %s229_s17  }
   0xb   : > { %p1420_p5 = por %p240_p2, %p239_p0  ;;  %p1424_p6 = por %p246_p4, %p245_p3 }
   0xc   : > { %p1066_p7 = scmp.ge.s32.totalorder %s1324_s14, 1  ;;  %p301_p8 = scmp.lt.s32.totalorder %s1324_s14, 3 }
   0xe   : > { %p302_p9 = pnand %p1066_p7, %p301_p8 }
   0xf   : > { %v369_v0 = vld [vmem:[%s1555_s3] sm:$0xff] (!%p302_p9)  ;;  %v370_v1 = vld [vmem:[%s1555_s3 + $0x8] sm:$0xff] (!%p302_p9)  ;;  %p342_p10 = scmp.lt.s32.totalorder (!%p302_p9), %s1403_s6, 1  ;;  %vm371_vm0 = vcmask (!%p302_p9), 130048   ;;  %vm501_vm1 = vcmask (!%p302_p9), 64512   ;;  %vm795_vm2 = vcmask (!%p302_p9), 1041409  }
  0x10   : > { %305 = sbr.rel (%p302_p9) target bundleno = 891 (0x37b), region = 56  ;;  %v1175_v2 = vpack.c.bf16 (!%p302_p9), %v370_v1, %v369_v0  ;;  %v360_v3 = vld [vmem:[%s1554_s2] sm:$0xff] (!%p302_p9)  ;;  %vm797_vm3 = vcmask (!%p302_p9), 1042434   ;;  %vm799_vm4 = vcmask (!%p302_p9), 1043459   ;;  %vm801_vm5 = vcmask (!%p302_p9), 1044484   ;;  %s339_s18 = sand.u32 (!%p302_p9), 1, %s1316_s12  }
  0x11   : > { %v1088_v22 = vld [vmem:[%s1556_s4] ss:$0 sm:$0xff] (!%p302_p9)  ;;  %vm803_vm6 = vcmask (!%p302_p9), 1045509   ;;  %vm805_vm7 = vcmask (!%p302_p9), 1046534   ;;  %vm807_vm8 = vcmask (!%p302_p9), 1047559   ;;  %s1109_s25 = sshll.u32 (!%p302_p9), %s1403_s6, 8 }
  0x12   : > { %1176 = vmatprep.subr.bf16.mxu0 (!%p302_p9), %v1175_v2  ;;  %1179 = vmatprep.subr.bf16.mxu1 (!%p302_p9), %v1175_v2  ;;  %v1089_v29 = vld [vmem:[%s1557_s5] ss:$0 sm:$0xff] (!%p302_p9)  ;;  %s1507_s28 = scalar_lea.hbm (!%p302_p9), %s1561_s9, %s1109_s25 }
  0x13   : > { %1178 = vmatpush3.bf16.msra.mxu0 (!%p302_p9), %v1175_v2  ;;  %1180 = vmatpush3.bf16.msra.mxu1 (!%p302_p9), %v1175_v2 }
  0x14   : > { %1151 = vmatprep.subr.mxu0 (!%p302_p9), %v360_v3 }
  0x17   : > { %s343_s26 = scalar_select %p342_p10, %s1403_s6, 1 }
  0x18   : > { %s1326_s6 = smov [#allocation3]  }
  0x19   : > { %s1107_s29 = sshll.u32 %s343_s26, 6  ;;  %s1266_s10 = sshll.u32 %s1326_s6, 4  ;;  %s1267_s10 = int_to_ptr.vmem [resolvable:$false] %s1266_s10 }
  0x1a   : > { %s1444_s15 = scalar_lea.vmem %s1552_s0, %s1107_s29  ;;  %s351_s22 = scalar_lea.vmem %s1553_s1, %s1107_s29 }
  0x1b   : > { %v361_v4 = vld [vmem:[%s351_s22] sm:$0xff]  ;;  %v362_v5 = vld [vmem:[%s351_s22 + $0x8] sm:$0xff]  ;;  %v363_v7 = vld [vmem:[%s351_s22 + $0x10] sm:$0xff]  ;;  %s693_s29 = sld [smem:[#allocation2]] }
  0x1c   : > { %v352_v6 = vld [vmem:[%s1444_s15] sm:$0xff]  ;;  %1139 = vmatprep.mubr.msk.f32.mxu0 %vm371_vm0, %v361_v4  ;;  %v364_v8 = vld [vmem:[%s351_s22 + $0x18] sm:$0xff]  ;;  %1142 = vmatprep.mubr.msk.f32.mxu1 %vm371_vm0, %v363_v7  ;;  %v366_v10 = vld [vmem:[%s351_s22 + $0x28] sm:$0xff] }
  0x1d   : > { %1140 = vmatmul.mubr.msk.f32.vlgmr.msra.gmra.mrb[0].mxu0 %vm371_vm0, %v362_v5  ;;  %v365_v9 = vld [vmem:[%s351_s22 + $0x20] sm:$0xff]  ;;  %1143 = vmatmul.mubr.msk.f32.vlgmr.msra.gmra.mrb[0].mxu1 %vm371_vm0, %v364_v8  ;;  %v367_v11 = vld [vmem:[%s351_s22 + $0x30] sm:$0xff]  ;;  %v353_v12 = vld [vmem:[%s1444_s15 + $0x8] sm:$0xff] }
  0x1e   : > { %1152 = vmatpush3.msra.mxu0 %v360_v3  ;;  %1153 = vmatprep.mubr.msk.f32.mxu0 %vm501_vm1, %v352_v6  ;;  %v354_v13 = vld [vmem:[%s1444_s15 + $0x10] sm:$0xff]  ;;  %v368_v14 = vld [vmem:[%s351_s22 + $0x38] sm:$0xff]  ;;  %v356_v16 = vld [vmem:[%s1444_s15 + $0x20] sm:$0xff]  ;;  %s1067_s22 = sshll.u32 %s339_s18, 4 }
  0x1f   : > { %1145 = vmatprep.mubr.msk.f32.mxu1 %vm371_vm0, %v365_v9  ;;  %v355_v15 = vld [vmem:[%s1444_s15 + $0x18] sm:$0xff]  ;;  %v357_v17 = vld [vmem:[%s1444_s15 + $0x28] sm:$0xff]  ;;  %v358_v18 = vld [vmem:[%s1444_s15 + $0x30] sm:$0xff]  ;;  %s341_s23 = scalar_lea.vmem [#allocation3], %s1067_s22 }
  0x20   : > { %v359_v19 = vld [vmem:[%s1444_s15 + $0x38] sm:$0xff]  ;;  %s989_s24 = sshll.u32 %s341_s23, 4  ;;  %s1268_s15 = scalar_lea.vmem %s1267_s10, 512  ;;  %s1502_s24 = int_to_ptr.vmem [resolvable:$true] %s989_s24 }
  0x21   : > { %1146 = vmatmul.mubr.msk.f32.gmra.mrb[2].mxu1 %vm371_vm0, %v366_v10  ;;  %v751_v10 = vld [vmem:[%s1559_s7] sm:$0xff]  ;;  %s1262_s30 = scalar_lea.vmem %s1502_s24, 256  ;;  %p1269_p0 = scmp.lt.s32.totalorder %s1502_s24, %s1267_s10 }
  0x22   : > { %1148 = vmatprep.mubr.msk.f32.mxu1 %vm371_vm0, %v367_v11  ;;  %v694_v11 = vstv %s693_s29  ;;  %s1511_s29 = scalar_lea.sflag [#allocation4], %s339_s18  ;;  %p1263_p11 = scmp.ne.s32.totalorder %s1502_s24, %s1262_s30 }
  0x23   : > { %p1270_p1 = scmp.lt.s32.totalorder %s1268_s15, %s1262_s30 }
  0x24   : > { %p1264_p12 = pnand %p1263_p11, %p1420_p5 }
  0x25   : > { %1154 = vmatmul.mubr.msk.f32.vlgmr.msra.gmra.mrb[0].mxu0 %vm501_vm1, %v353_v12  ;;  %1149 = vmatmul.mubr.msk.f32.gmra.mrb[4].mxu1 %vm371_vm0, %v368_v14  ;;  %p1271_p2 = por %p1270_p1, %p1269_p0 }
  0x26   : > { %1156 = vmatprep.mubr.msk.f32.mxu0 %vm501_vm1, %v354_v13  ;;  %1167 = vmatprep.mubr.msk.f32.mxu1 %vm501_vm1, %v751_v10  ;;  %p1265_p13 = pneg %p1264_p12 }
  0x28   : > { %p1272_p3 = pnand %p1271_p2, %p1265_p13 }
  0x29   : > { %1157 = vmatmul.mubr.msk.f32.gmra.mrb[2].mxu0 %vm501_vm1, %v355_v15 }
  0x2a   : > { %1159 = vmatprep.mubr.msk.f32.mxu0 %vm501_vm1, %v356_v16 }
  0x2d   : > { %1160 = vmatmul.mubr.msk.f32.gmra.mrb[4].mxu0 %vm501_vm1, %v357_v17 }
  0x2e   : > { %1162 = vmatprep.mubr.msk.f32.mxu0 %vm501_vm1, %v358_v18 }
  0x31   : > { %1163 = vmatmul.mubr.msk.f32.gmra.mrb[6].mxu0 %vm501_vm1, %v359_v19 }
  0xf0   : > { %v1144_v20 = vpop.f32.mrb[0].mxu1 }
  0xf1   : > { %v472_v21 = vpop.f32.mrb[1].mxu1 }
  0xf4   : > { %v1147_v23 = vpop.f32.mrb[2].mxu1 }
  0xf5   : > { %v482_v24 = vpop.f32.mrb[3].mxu1 }
  0xf8   : > { %v1155_v25 = vpop.f32.mrb[0].mxu0  ;;  %v1150_v30 = vpop.f32.mrb[4].mxu1 }
  0xf9   : > { %v639_v26 = vadd.f32 %v1155_v25, %v1088_v22  ;;  %v592_v27 = vpop.f32.mrb[1].mxu0  ;;  %v492_v32 = vpop.f32.mrb[5].mxu1 }
  0xfa   : > { %v638_v28 = vadd.f32 %v1088_v22, %v592_v27 }
  0xfb   : > { %v647_v31 = vmax.f32 %v639_v26, 0.0 }
  0xfc   : > { %v646_v33 = vmax.f32 %v638_v28, 0.0  ;;  %v1158_v34 = vpop.f32.mrb[2].mxu0 }
  0xfd   : > { %v608_v35 = vadd.f32 %v1158_v34, %v1144_v20  ;;  %v602_v36 = vpop.f32.mrb[3].mxu0  ;;  %v662_v37 = vmul.f32 %v1089_v29, %v647_v31 }
  0xfe   : > { %v603_v38 = vadd.f32 %v602_v36, %v472_v21  ;;  %v661_v41 = vmul.f32 %v1089_v29, %v646_v33 }
  0xff   : > { %v641_v39 = vadd.f32 %v1088_v22, %v608_v35  ;;  %v672_v40 = vsel %vm501_vm1, %v662_v37, 0.0 }
 0x100   : > { %v640_v42 = vadd.f32 %v1088_v22, %v603_v38  ;;  %673 = vadd.xlane.f32.xlu0 %v672_v40  ;;  %v1161_v43 = vpop.f32.mrb[4].mxu0  ;;  %v669_v50 = vsel %vm501_vm1, %v661_v41, 0.0 }
 0x101   : > { %v649_v44 = vmax.f32 %v641_v39, 0.0  ;;  %v618_v45 = vadd.f32 %v1161_v43, %v1147_v23  ;;  %v612_v46 = vpop.f32.mrb[5].mxu0 }
 0x102   : > { %v648_v47 = vmax.f32 %v640_v42, 0.0  ;;  %v613_v48 = vadd.f32 %v612_v46, %v482_v24 }
 0x103   : > { %v643_v49 = vadd.f32 %v1088_v22, %v618_v45  ;;  %v664_v51 = vmul.f32 %v1089_v29, %v649_v44  ;;  %v761_v44 = vlaneseq }
 0x104   : > { %v642_v52 = vadd.f32 %v1088_v22, %v613_v48  ;;  %670 = vadd.xlane.f32.xlu0 %v669_v50  ;;  %v1164_v53 = vpop.f32.mrb[6].mxu0  ;;  %v663_v58 = vmul.f32 %v1089_v29, %v648_v47 }
 0x105   : > { %v651_v54 = vmax.f32 %v643_v49, 0.0  ;;  %v628_v55 = vadd.f32 %v1164_v53, %v1150_v30  ;;  %v622_v56 = vpop.f32.mrb[7].mxu0  ;;  %v678_v57 = vsel %vm501_vm1, %v664_v51, 0.0  ;;  %v762_v49 = vand.u32 127, %v761_v44 }
 0x106   : > { %v650_v59 = vmax.f32 %v642_v52, 0.0  ;;  %v623_v60 = vadd.f32 %v622_v56, %v492_v32  ;;  %679 = vadd.xlane.f32.xlu1 %v678_v57  ;;  %v675_v1 = vsel %vm501_vm1, %v663_v58, 0.0  ;;  %v764_v50 = vshrl.u32 %v761_v44, 7 }
 0x107   : > { %v645_v61 = vadd.f32 %v1088_v22, %v628_v55  ;;  %v666_v2 = vmul.f32 %v1089_v29, %v651_v54 }
 0x108   : > { %v644_v62 = vadd.f32 %v1088_v22, %v623_v60  ;;  %v665_v63 = vmul.f32 %v1089_v29, %v650_v59  ;;  %v765_v55 = vsub.s32 %v762_v49, %v764_v50 }
 0x109   : > { %v653_v0 = vmax.f32 %v645_v61, 0.0  ;;  %v684_v6 = vsel %vm501_vm1, %v666_v2, 0.0 }
 0x10a   : > { %v652_v3 = vmax.f32 %v644_v62, 0.0  ;;  %676 = vadd.xlane.f32.xlu1 %v675_v1  ;;  %v681_v4 = vsel %vm501_vm1, %v665_v63, 0.0 }
 0x10b   : > { %682 = vadd.xlane.f32.xlu0 %v681_v4  ;;  %v668_v7 = vmul.f32 %v1089_v29, %v653_v0 }
 0x10c   : > { %v667_v5 = vmul.f32 %v1089_v29, %v652_v3 }
 0x10d   : > { %v690_v9 = vsel %vm501_vm1, %v668_v7, 0.0 }
 0x10e   : > { %685 = vadd.xlane.f32.xlu1 %v684_v6  ;;  %v687_v8 = vsel %vm501_vm1, %v667_v5, 0.0 }
 0x10f   : > { %688 = vadd.xlane.f32.xlu0 %v687_v8 }
 0x112   : > { %691 = vadd.xlane.f32.xlu1 %v690_v9 }
 0x18d   : > { %v674_v12 = vpop.xlane.xlu0 %673 }
 0x18e   : > { %v696_v13 = vadd.f32 %v694_v11, %v674_v12 }
 0x190   : > { %v1091_v14 = vmul.f32 -1.442695, %v696_v13 }
 0x191   : > { %v671_v15 = vpop.xlane.xlu0 %670 }
 0x192   : > { %v695_v16 = vadd.f32 %v694_v11, %v671_v15  ;;  %1230 = vpow2.f32 %v1091_v14  ;;  %v752_v15 = vld [vmem:[%s1559_s7 + $0x8] sm:$0xff] }
 0x193   : > { %v680_v17 = vpop.xlane.xlu1 %679 }
 0x194   : > { %v1090_v18 = vmul.f32 -1.442695, %v695_v16  ;;  %v698_v19 = vadd.f32 %v694_v11, %v680_v17  ;;  %v891_v16 = vld [vmem:[%s1560_s8] sm:$0xff] }
 0x196   : > { %1232 = vpow2.f32 %v1090_v18  ;;  %v1093_v20 = vmul.f32 -1.442695, %v698_v19 }
 0x197   : > { %v677_v21 = vpop.xlane.xlu1 %676 }
 0x198   : > { %1234 = vpow2.f32 %v1093_v20  ;;  %v697_v22 = vadd.f32 %v694_v11, %v677_v21  ;;  %v683_v23 = vpop.xlane.xlu0 %682 }
 0x199   : > { %v699_v24 = vadd.f32 %v694_v11, %v683_v23 }
 0x19a   : > { %v1092_v25 = vmul.f32 -1.442695, %v697_v22 }
 0x19b   : > { %v1094_v26 = vmul.f32 -1.442695, %v699_v24  ;;  %v686_v27 = vpop.xlane.xlu1 %685 }
 0x19c   : > { %1236 = vpow2.f32 %v1092_v25  ;;  %v700_v28 = vadd.f32 %v694_v11, %v686_v27  ;;  %v689_v29 = vpop.xlane.xlu0 %688  ;;  %v1231_v32 = vpop.eup %1230 }
 0x19d   : > { %1238 = vpow2.f32 %v1094_v26  ;;  %v701_v30 = vadd.f32 %v694_v11, %v689_v29  ;;  %v728_v39 = vadd.f32 1.0, %v1231_v32 }
 0x19e   : > { %v1095_v31 = vmul.f32 -1.442695, %v700_v28 }
 0x19f   : > { %v1096_v33 = vmul.f32 -1.442695, %v701_v30  ;;  %v692_v34 = vpop.xlane.xlu1 %691 }
 0x1a0   : > { %v1233_v35 = vpop.eup %1232  ;;  %1240 = vpow2.f32 %v1095_v31  ;;  %v702_v36 = vadd.f32 %v694_v11, %v692_v34 }
 0x1a1   : > { %v727_v37 = vadd.f32 1.0, %v1233_v35  ;;  %1242 = vpow2.f32 %v1096_v33 }
 0x1a2   : > { %v1235_v38 = vpop.eup %1234  ;;  %v1097_v40 = vmul.f32 -1.442695, %v702_v36 }
 0x1a3   : > { %1244 = vrcp.f32 %v727_v37  ;;  %v730_v41 = vadd.f32 1.0, %v1235_v38 }
 0x1a4   : > { %1246 = vpow2.f32 %v1097_v40 }
 0x1a5   : > { %1248 = vrcp.f32 %v728_v39 }
 0x1a6   : > { %v1237_v42 = vpop.eup %1236  ;;  %1250 = vrcp.f32 %v730_v41 }
 0x1a7   : > { %v1239_v43 = vpop.eup %1238  ;;  %v729_v45 = vadd.f32 1.0, %v1237_v42 }
 0x1a8   : > { %v731_v46 = vadd.f32 1.0, %v1239_v43 }
 0x1a9   : > { %1252 = vrcp.f32 %v729_v45 }
 0x1aa   : > { %v1241_v47 = vpop.eup %1240  ;;  %1254 = vrcp.f32 %v731_v46 }
 0x1ab   : > { %v1243_v48 = vpop.eup %1242  ;;  %v732_v51 = vadd.f32 1.0, %v1241_v47 }
 0x1ac   : > { %v733_v52 = vadd.f32 1.0, %v1243_v48 }
 0x1ad   : > { %v1245_v53 = vpop.eup %1244  ;;  %1256 = vrcp.f32 %v732_v51 }
 0x1ae   : > { %v1247_v54 = vpop.eup %1246  ;;  %1258 = vrcp.f32 %v733_v52  ;;  %v766_v58 = vrot.slane %v1245_v53, %v765_v55 }
 0x1af   : > { %v734_v56 = vadd.f32 1.0, %v1247_v54  ;;  %v1249_v57 = vpop.eup %1248 }
 0x1b0   : > { %v1251_v59 = vpop.eup %1250  ;;  %v770_v61 = vrot.slane %v1249_v57, %v765_v55 }
 0x1b1   : > { %1260 = vrcp.f32 %v734_v56  ;;  %v778_v0 = vrot.slane %v1251_v59, %v765_v55 }
 0x1b2   : > { %v796_v2 = vsel %vm795_vm2, %v770_v61, %v766_v58 }
 0x1b3   : > { %v1253_v60 = vpop.eup %1252 }
 0x1b4   : > { %v1255_v62 = vpop.eup %1254  ;;  %v774_v63 = vrot.slane %v1253_v60, %v765_v55 }
 0x1b5   : > { %v782_v1 = vrot.slane %v1255_v62, %v765_v55 }
 0x1b6   : > { %v798_v3 = vsel %vm797_vm3, %v774_v63, %v796_v2 }
 0x1b7   : > { %v1257_v4 = vpop.eup %1256  ;;  %v800_v5 = vsel %vm799_vm4, %v778_v0, %v798_v3 }
 0x1b8   : > { %v1259_v6 = vpop.eup %1258  ;;  %v786_v7 = vrot.slane %v1257_v4, %v765_v55  ;;  %v802_v8 = vsel %vm801_vm5, %v782_v1, %v800_v5 }
 0x1b9   : > { %v790_v9 = vrot.slane %v1259_v6, %v765_v55 }
 0x1ba   : > { %v804_v10 = vsel %vm803_vm6, %v786_v7, %v802_v8 }
 0x1bb   : > { %v1261_v11 = vpop.eup %1260  ;;  %v806_v13 = vsel %vm805_vm7, %v790_v9, %v804_v10 }
 0x1bc   : > { %v794_v12 = vrot.slane %v1261_v11, %v765_v55 }
 0x1be   : > { %v808_v14 = vsel %vm807_vm8, %v794_v12, %v806_v13 }
 0x1bf   : > { %1165 = vmatprep.subr.mxu1 %v808_v14 }
 0x1c0   : > { %1166 = vmatpush3.msra.mxu1 %v808_v14 }
 0x1c1   : > { %1168 = vmatmul.mubr.msk.f32.vlgmr.msra.gmra.mrb[6].mxu1 %vm501_vm1, %v752_v15  ;;  %1170 = vmatprep.subr.mxu1 %v891_v16 }
 0x1c2   : > { %1171 = vmatpush3.msra.mxu1 %v891_v16 }
 0x294   : > { %v1169_v17 = vpop.f32.mrb[6].mxu1 }
 0x295   : > { %v882_v18 = vpop.f32.mrb[7].mxu1 }
 0x296   : > { %1172 = vmatprep.mubr.msk.f32.mxu1 %vm501_vm1, %v882_v18 }
 0x297   : > { %1173 = vmatmul.mubr.msk.f32.vlgmr.msra.gmra.mrb[8].mxu1 %vm501_vm1, %v1169_v17 }
 0x36a   : > { %v1174_v19 = vpop.f32.mrb[8].mxu1 }
 0x36b   : > { %974 = vst.msk [vmem:[%s341_s23 + $0x8] sm:$0xff] %vm371_vm0, %v1174_v19  ;;  %v964_v20 = vpop.f32.mrb[9].mxu1 }
 0x36c   : > { %973 = vst.msk [vmem:[%s341_s23] sm:$0xff] %vm371_vm0, %v964_v20 }
 0x36d   : > { %1275 = shalt.err (!%p1272_p3)
}
 0x36e   : > { %s1276_s17 = scalar_lea.hbm %s1507_s28, 256  ;;  %s1280_s23 = scalar_lea.hbm %s1561_s9, 512 }
 0x36f   : > { %p1277_p4 = scmp.ne.s32.totalorder %s1507_s28, %s1276_s17  ;;  %p1281_p9 = scmp.lt.u32.totalorder %s1507_s28, %s1561_s9 }
 0x370   : > { %p1282_p10 = scmp.lt.u32.totalorder %s1280_s23, %s1276_s17  ;;  %p1284_p12 = scmp.lt.u32.totalorder %s1276_s17, %s1507_s28 }
 0x371   : > { %p1278_p7 = pnand %p1277_p4, %p1420_p5 }
 0x372   : > { %p1283_p11 = por %p1282_p10, %p1281_p9 }
 0x373   : > { %p1279_p8 = pneg %p1278_p7 }
 0x374   : > { %p1285_p13 = por %p1284_p12, %p1283_p11 }
 0x376   : > { %p1286_p0 = pnand %p1285_p13, %p1279_p8 }
 0x378   : > { %1289 = shalt.err (!%p1286_p0)
}
 0x379   : > { %s1327_s27 = smov 128   ;;  %s1328_s30 = smov 8  }
 0x37a   : > { %1189 = dma.vmem_to_hbm [thread:$0]  (%p1420_p5), %s1502_s24, 256, %s1507_s28, %s1511_s29, %s1327_s27, %s1327_s27, %s1328_s30  }
 0x37b PF: > { %p1195_p1 = scmp.ge.s32.totalorder %s1324_s14, 2  ;;  %s1004_s6 = sand.u32 1, %s1312_s11  }
 0x37c   : > { %s1005_s10 = scalar_lea.sflag [#allocation4], %s1004_s6 }
 0x37d   : > { %p1192_p2 = pnand %p1195_p1, %p1424_p6 }
 0x37f   : > { %1307 = dma.done.wait (!%p1192_p2), %s1005_s10, 256  }
 0x380   : > { %1309 = vsyncadd (!%p1192_p2), %s1005_s10, 4294967040  ;;  %p20_p3 = scmp.ge.s32.totalorder %s1407_s16, 4   ;;  %s1564_s11 = smov %s1316_s12 }
 0x381   : > { %s1565_s12 = smov %s1320_s13  ;;  %s1566_s13 = smov %s1418_s19 }
 0x382   : > { %s1567_s14 = smov %s1407_s16  ;;  %22 = sbr.rel (!%p20_p3) target bundleno = 5 (0x5), region = 94 }
 0x389   :  { %1010 = vsyncpa [#allocation4], 1 }
 0x38a   :  { %1012 = vsyncpa [#allocation4 + $0x1], 1 }

</bundles_post_ra>
